<compile_context>
chip_gen: v7x
topology: tpu7x:2x2x1
jax: 0.10.0
libtpu: 0.0.40
codegen_flags: <defaults>
</compile_context>

<pallas_src>
import functools

import jax
import jax.numpy as jnp
import numpy as np
from jax.experimental import pallas as pl
from jax.experimental.pallas import tpu as pltpu


def _mlp_argmax_kernel(x_ref, w1_ref, b1_ref, w2_ref, b2_ref, w3_ref, b3_ref,
                       act_ref, *, action_dim):
    # x tile: (TB, obs_dim) f32 -> bf16 for the MXU; accumulate in f32.
    x = x_ref[...].astype(jnp.bfloat16)

    h1 = jnp.dot(x, w1_ref[...], preferred_element_type=jnp.float32) + b1_ref[...]
    h1 = jnp.maximum(h1, 0.0).astype(jnp.bfloat16)

    h2 = jnp.dot(h1, w2_ref[...], preferred_element_type=jnp.float32) + b2_ref[...]
    h2 = jnp.maximum(h2, 0.0).astype(jnp.bfloat16)

    q = jnp.dot(h2, w3_ref[...], preferred_element_type=jnp.float32) + b3_ref[...]

    # Mask padded action columns directly (no bias-sentinel dependence), then
    # argmax with first-occurrence tie-breaking (matches torch.argmax).
    col = jax.lax.broadcasted_iota(jnp.int32, q.shape, 1)
    q = jnp.where(col < action_dim, q, -jnp.inf)
    m = jnp.max(q, axis=-1, keepdims=True)
    big = jnp.int32(2 ** 30)
    idx = jnp.min(jnp.where(q == m, col, big), axis=-1)   # (TB,) int32

    # Lane-dense store: one (1, TB) row per grid step.
    act_ref[...] = idx[None, :]


def meta_controller_forward(x, params, *, action_dim, block_b=128):
    """x: (B, obs_dim) float32. Returns actions: (B,) int32."""
    w1, b1, w2, b2, w3p, b3p = params
    B, obs_dim = x.shape
    H = w1.shape[1]
    A_pad = w3p.shape[1]

    num_tiles = pl.cdiv(B, block_b)
    B_pad = num_tiles * block_b
    if B_pad != B:
        x = jnp.pad(x, ((0, B_pad - B), (0, 0)))

    kernel = functools.partial(_mlp_argmax_kernel, action_dim=action_dim)

    def x_map(i):
        return (i, 0)

    def const_map(i):
        return (0, 0)

    def out_map(i):
        return (0, i)

    grid_spec = pltpu.PrefetchScalarGridSpec(
        num_scalar_prefetch=0,
        grid=(num_tiles,),
        in_specs=[
            pl.BlockSpec((block_b, obs_dim), x_map),   # x tile (pipelined)
            pl.BlockSpec((obs_dim, H), const_map),     # resident weights
            pl.BlockSpec((1, H), const_map),
            pl.BlockSpec((H, H), const_map),
            pl.BlockSpec((1, H), const_map),
            pl.BlockSpec((H, A_pad), const_map),
            pl.BlockSpec((1, A_pad), const_map),
        ],
        out_specs=pl.BlockSpec((1, block_b), out_map),  # lane-dense actions
    )

    flops = 2 * B_pad * (obs_dim * H + H * H + H * A_pad)
    bytes_accessed = (
        x.size * x.dtype.itemsize
        + sum(int(p.size) * p.dtype.itemsize for p in params)
        + B_pad * 4
    )

    out = pl.pallas_call(
        kernel,
        out_shape=jax.ShapeDtypeStruct((1, B_pad), jnp.int32),
        grid_spec=grid_spec,
        compiler_params=pltpu.CompilerParams(
            dimension_semantics=("parallel",)),
        cost_estimate=pl.CostEstimate(
            flops=flops, transcendentals=0, bytes_accessed=bytes_accessed),
    )(x, w1, b1, w2, b2, w3p, b3p)

    return out[0, :B]


def init_params(key, obs_dim, hidden_size, action_dim, action_pad=128):
    """nn.Linear-style init U(-1/sqrt(fan_in), 1/sqrt(fan_in)); bf16 weights."""
    ks = jax.random.split(key, 6)

    def lin(kw, kb, fan_in, fan_out):
        bound = 1.0 / np.sqrt(fan_in)
        w = jax.random.uniform(kw, (fan_in, fan_out), jnp.float32, -bound, bound)
        b = jax.random.uniform(kb, (1, fan_out), jnp.float32, -bound, bound)
        return w, b

    w1, b1 = lin(ks[0], ks[1], obs_dim, hidden_size)
    w2, b2 = lin(ks[2], ks[3], hidden_size, hidden_size)
    w3, b3 = lin(ks[4], ks[5], hidden_size, action_dim)

    # Kernel weights: bf16, action dim zero-padded to a lane-dense width.
    a_pad = max(action_pad, action_dim)
    w1k = w1.astype(jnp.bfloat16)
    w2k = w2.astype(jnp.bfloat16)
    w3k = jnp.zeros((hidden_size, a_pad), jnp.bfloat16).at[:, :action_dim].set(
        w3.astype(jnp.bfloat16))
    b3k = jnp.zeros((1, a_pad), jnp.float32).at[:, :action_dim].set(b3)

    kernel_params = (w1k, b1, w2k, b2, w3k, b3k)
    # Reference params = the same bf16 weights upcast to f32 (matches kernel math).
    ref_params = (w1k.astype(jnp.float32), b1,
                  w2k.astype(jnp.float32), b2,
                  w3.astype(jnp.bfloat16).astype(jnp.float32), b3)
    return kernel_params, ref_params


def reference_q(x, ref_params):
    w1, b1, w2, b2, w3, b3 = ref_params
    h1 = jnp.maximum(x @ w1 + b1, 0.0)
    h2 = jnp.maximum(h1 @ w2 + b2, 0.0)
    return h2 @ w3 + b3


# TODO(synk): MultiDiscrete action spaces add an elementwise mod/floordiv
# decomposition of the argmax index; only the Discrete branch is implemented.

if __name__ == "__main__":
    B, OBS_DIM, HIDDEN, ACTION_DIM = 200, 16, 128, 6   # B not a tile multiple

    key = jax.random.PRNGKey(0)
    k_params, k_x = jax.random.split(key)
    params, ref_params = init_params(k_params, OBS_DIM, HIDDEN, ACTION_DIM)
    x = jax.random.normal(k_x, (B, OBS_DIM), jnp.float32)

    fwd = jax.jit(
        lambda inp: meta_controller_forward(inp, params, action_dim=ACTION_DIM))
    actions = fwd(x)
    jax.block_until_ready(actions)

    assert actions.shape == (B,), actions.shape
    assert actions.dtype == jnp.int32, actions.dtype

    act_np = np.asarray(actions)
    assert np.all(act_np >= 0) and np.all(act_np < ACTION_DIM)

    # Robust correctness check against an f32 reference using the same
    # bf16-quantized weights: the chosen action's Q-value must be within a
    # small tolerance of the row max, and rows with a clear top-2 gap must
    # match the reference argmax exactly.
    q_ref = np.asarray(reference_q(x, ref_params))
    best = q_ref.max(axis=-1)
    picked = q_ref[np.arange(B), act_np]
    np.testing.assert_array_less(best - picked, 1e-3 * np.maximum(1.0, np.abs(best)) + 1e-5)

    srt = np.sort(q_ref, axis=-1)
    clear = (srt[:, -1] - srt[:, -2]) > 1e-3
    ref_act = q_ref.argmax(axis=-1).astype(np.int32)
    assert np.array_equal(act_np[clear], ref_act[clear])

    print("KERNEL_OK")
</pallas_src>

<mosaic_0001>
module attributes {stable_mosaic.version = 11 : i64} {
  func.func @_mlp_argmax_kernel(%arg0: i32, %arg1: memref<128x16xf32, #tpu.memory_space<vmem>>, %arg2: memref<16x128xbf16, #tpu.memory_space<vmem>>, %arg3: memref<1x128xf32, #tpu.memory_space<vmem>>, %arg4: memref<128x128xbf16, #tpu.memory_space<vmem>>, %arg5: memref<1x128xf32, #tpu.memory_space<vmem>>, %arg6: memref<128x128xbf16, #tpu.memory_space<vmem>>, %arg7: memref<1x128xf32, #tpu.memory_space<vmem>>, %arg8: memref<1x128xi32, #tpu.memory_space<vmem>>) attributes {dimension_semantics = [#tpu.dimension_semantics<parallel>], iteration_bounds = array<i64: 2>, scalar_prefetch = 0 : i64, scratch_operands = 0 : i64, tpu.core_type = #tpu.core_type<tc>, window_params = [{transform_indices = @transform_0, window_bounds = array<i64: 128, 16>}, {pipeline_mode = #tpu.pipeline_mode<synchronous>, transform_indices = @transform_1, window_bounds = array<i64: 16, 128>}, {pipeline_mode = #tpu.pipeline_mode<synchronous>, transform_indices = @transform_2, window_bounds = array<i64: 1, 128>}, {pipeline_mode = #tpu.pipeline_mode<synchronous>, transform_indices = @transform_3, window_bounds = array<i64: 128, 128>}, {pipeline_mode = #tpu.pipeline_mode<synchronous>, transform_indices = @transform_4, window_bounds = array<i64: 1, 128>}, {pipeline_mode = #tpu.pipeline_mode<synchronous>, transform_indices = @transform_5, window_bounds = array<i64: 128, 128>}, {pipeline_mode = #tpu.pipeline_mode<synchronous>, transform_indices = @transform_6, window_bounds = array<i64: 1, 128>}, {transform_indices = @transform_7, window_bounds = array<i64: 1, 128>}]} {
    %c0 = arith.constant 0 : index
    %c0_0 = arith.constant 0 : index
    %0 = vector.load %arg1[%c0, %c0_0] : memref<128x16xf32, #tpu.memory_space<vmem>>, vector<128x16xf32>
    %1 = arith.truncf %0 : vector<128x16xf32> to vector<128x16xbf16>
    %c0_1 = arith.constant 0 : index
    %c0_2 = arith.constant 0 : index
    %2 = vector.load %arg2[%c0_1, %c0_2] : memref<16x128xbf16, #tpu.memory_space<vmem>>, vector<16x128xbf16>
    %cst = arith.constant dense<0.000000e+00> : vector<128x128xf32>
    %3 = tpu.matmul %1, %2, %cst {dimension_numbers = #tpu.dot_dimension_numbers<[1], [0], [0], [1], [0, 0, 1, 1], [], []>} : vector<128x16xbf16>, vector<16x128xbf16>, vector<128x128xf32> -> vector<128x128xf32>
    %c0_3 = arith.constant 0 : index
    %c0_4 = arith.constant 0 : index
    %4 = vector.load %arg3[%c0_3, %c0_4] : memref<1x128xf32, #tpu.memory_space<vmem>>, vector<1x128xf32>
    %5 = vector.broadcast %4 : vector<1x128xf32> to vector<128x128xf32>
    %6 = arith.addf %3, %5 : vector<128x128xf32>
    %cst_5 = arith.constant 0.000000e+00 : f32
    %7 = vector.broadcast %cst_5 : f32 to vector<128x128xf32>
    %8 = arith.maximumf %6, %7 : vector<128x128xf32>
    %9 = arith.truncf %8 : vector<128x128xf32> to vector<128x128xbf16>
    %c0_6 = arith.constant 0 : index
    %c0_7 = arith.constant 0 : index
    %10 = vector.load %arg4[%c0_6, %c0_7] : memref<128x128xbf16, #tpu.memory_space<vmem>>, vector<128x128xbf16>
    %cst_8 = arith.constant dense<0.000000e+00> : vector<128x128xf32>
    %11 = tpu.matmul %9, %10, %cst_8 {dimension_numbers = #tpu.dot_dimension_numbers<[1], [0], [0], [1], [0, 0, 1, 1], [], []>} : vector<128x128xbf16>, vector<128x128xbf16>, vector<128x128xf32> -> vector<128x128xf32>
    %c0_9 = arith.constant 0 : index
    %c0_10 = arith.constant 0 : index
    %12 = vector.load %arg5[%c0_9, %c0_10] : memref<1x128xf32, #tpu.memory_space<vmem>>, vector<1x128xf32>
    %13 = vector.broadcast %12 : vector<1x128xf32> to vector<128x128xf32>
    %14 = arith.addf %11, %13 : vector<128x128xf32>
    %cst_11 = arith.constant 0.000000e+00 : f32
    %15 = vector.broadcast %cst_11 : f32 to vector<128x128xf32>
    %16 = arith.maximumf %14, %15 : vector<128x128xf32>
    %17 = arith.truncf %16 : vector<128x128xf32> to vector<128x128xbf16>
    %c0_12 = arith.constant 0 : index
    %c0_13 = arith.constant 0 : index
    %18 = vector.load %arg6[%c0_12, %c0_13] : memref<128x128xbf16, #tpu.memory_space<vmem>>, vector<128x128xbf16>
    %cst_14 = arith.constant dense<0.000000e+00> : vector<128x128xf32>
    %19 = tpu.matmul %17, %18, %cst_14 {dimension_numbers = #tpu.dot_dimension_numbers<[1], [0], [0], [1], [0, 0, 1, 1], [], []>} : vector<128x128xbf16>, vector<128x128xbf16>, vector<128x128xf32> -> vector<128x128xf32>
    %c0_15 = arith.constant 0 : index
    %c0_16 = arith.constant 0 : index
    %20 = vector.load %arg7[%c0_15, %c0_16] : memref<1x128xf32, #tpu.memory_space<vmem>>, vector<1x128xf32>
    %21 = vector.broadcast %20 : vector<1x128xf32> to vector<128x128xf32>
    %22 = arith.addf %19, %21 : vector<128x128xf32>
    %23 = tpu.iota {dimensions = array<i32: 1>} : vector<128x128xi32>
    %c6_i32 = arith.constant 6 : i32
    %24 = vector.broadcast %c6_i32 : i32 to vector<128x128xi32>
    %25 = arith.cmpi slt, %23, %24 : vector<128x128xi32>
    %cst_17 = arith.constant 0xFF800000 : f32
    %26 = vector.broadcast %cst_17 : f32 to vector<128x128xf32>
    %27 = arith.select %25, %22, %26 : vector<128x128xi1>, vector<128x128xf32>
    %cst_18 = arith.constant dense<0xFF800000> : vector<128xf32>
    %28 = vector.multi_reduction <maximumf>, %27, %cst_18 [1] : vector<128x128xf32> to vector<128xf32>
    %29 = vector.shape_cast %28 : vector<128xf32> to vector<128x1xf32>
    %30 = vector.broadcast %29 : vector<128x1xf32> to vector<128x128xf32>
    %31 = arith.cmpf oeq, %27, %30 : vector<128x128xf32>
    %c1073741824_i32 = arith.constant 1073741824 : i32
    %32 = vector.broadcast %c1073741824_i32 : i32 to vector<128x128xi32>
    %33 = arith.select %31, %23, %32 : vector<128x128xi1>, vector<128x128xi32>
    %cst_19 = arith.constant dense<2147483647> : vector<128xi32>
    %34 = vector.multi_reduction <minsi>, %33, %cst_19 [1] : vector<128x128xi32> to vector<128xi32>
    %35 = vector.shape_cast %34 : vector<128xi32> to vector<1x128xi32>
    %c0_20 = arith.constant 0 : index
    %c0_21 = arith.constant 0 : index
    %36 = vector.load %arg8[%c0_20, %c0_21] : memref<1x128xi32, #tpu.memory_space<vmem>>, vector<1x128xi32>
    tpu.vector_store %arg8[%c0_20, %c0_21], %35 {strides = array<i32>} : memref<1x128xi32, #tpu.memory_space<vmem>>, vector<1x128xi32>,
    return
  }
  func.func @transform_0(%arg0: i32) -> (i32, i32) {
    %c0_i32 = arith.constant 0 : i32
    %c0_i32_0 = arith.constant 0 : i32
    return %arg0, %c0_i32 : i32, i32
  }
  func.func @transform_1(%arg0: i32) -> (i32, i32) {
    %c0_i32 = arith.constant 0 : i32
    %c0_i32_0 = arith.constant 0 : i32
    %c0_i32_1 = arith.constant 0 : i32
    return %c0_i32, %c0_i32_0 : i32, i32
  }
  func.func @transform_2(%arg0: i32) -> (i32, i32) {
    %c0_i32 = arith.constant 0 : i32
    %c0_i32_0 = arith.constant 0 : i32
    %c0_i32_1 = arith.constant 0 : i32
    return %c0_i32, %c0_i32_0 : i32, i32
  }
  func.func @transform_3(%arg0: i32) -> (i32, i32) {
    %c0_i32 = arith.constant 0 : i32
    %c0_i32_0 = arith.constant 0 : i32
    %c0_i32_1 = arith.constant 0 : i32
    return %c0_i32, %c0_i32_0 : i32, i32
  }
  func.func @transform_4(%arg0: i32) -> (i32, i32) {
    %c0_i32 = arith.constant 0 : i32
    %c0_i32_0 = arith.constant 0 : i32
    %c0_i32_1 = arith.constant 0 : i32
    return %c0_i32, %c0_i32_0 : i32, i32
  }
  func.func @transform_5(%arg0: i32) -> (i32, i32) {
    %c0_i32 = arith.constant 0 : i32
    %c0_i32_0 = arith.constant 0 : i32
    %c0_i32_1 = arith.constant 0 : i32
    return %c0_i32, %c0_i32_0 : i32, i32
  }
  func.func @transform_6(%arg0: i32) -> (i32, i32) {
    %c0_i32 = arith.constant 0 : i32
    %c0_i32_0 = arith.constant 0 : i32
    %c0_i32_1 = arith.constant 0 : i32
    return %c0_i32, %c0_i32_0 : i32, i32
  }
  func.func @transform_7(%arg0: i32) -> (i32, i32) {
    %c0_i32 = arith.constant 0 : i32
    %c0_i32_0 = arith.constant 0 : i32
    return %c0_i32, %arg0 : i32, i32
  }
}

</mosaic_0001>

<bundles_post_ra>
// kernel: _lambda_.1
= control target key start
LH: loop header
LB: loop body
LE: loop exit
PB: predicated region body
PF: predicated region fallthrough
CT: control target
= control target key end

     0   :  { %12 = vsyncpa [#allocation3], 0  ;;  %s2180_s0 = inlined_call_operand.vmem [shape: f32[256,16], index: 0, kind: input, shape index: {}]   ;;  %s2181_s1 = inlined_call_operand.vmem [shape: bf16[16,128], index: 1, kind: input, shape index: {}]   ;;  %s2182_s2 = inlined_call_operand.vmem [shape: f32[1,128], index: 2, kind: input, shape index: {}]   ;;  %s2183_s3 = inlined_call_operand.vmem [shape: bf16[128,128], index: 3, kind: input, shape index: {}]   ;;  %s2184_s4 = inlined_call_operand.vmem [shape: f32[1,128], index: 4, kind: input, shape index: {}]   ;;  %s2185_s5 = inlined_call_operand.vmem [shape: bf16[128,128], index: 5, kind: input, shape index: {}]   ;;  %s2186_s6 = inlined_call_operand.vmem [shape: f32[1,128], index: 6, kind: input, shape index: {}]   ;;  %s2187_s7 = inlined_call_operand.hbm [shape: s32[1,256], index: 7, kind: output, shape index: {}]  }
   0x1   :  { %14 = vsyncpa [#allocation3 + $0x1], 0  ;;  %s1630_s24 = smov 0   ;;  %s1632_s25 = smov 0  }
   0x2   :  { %s1634_s26 = smov 0   ;;  %s1636_s27 = smov 0  }
   0x3 LB: > { %s1308_s28 = sadd.s32 4294967295, %s1587_s27   ;;  %s1309_s29 = sadd.s32 4294967294, %s1587_s27   ;;  %s1587_s27 = sphi %s1636_s27, %s2193_s27   ;;  %s1583_s26 = sphi %s1634_s26, %s2192_s26   ;;  %s1579_s25 = sphi %s1632_s25, %s2191_s25   ;;  %s1575_s24 = sphi %s1630_s24, %s2190_s24  }
   0x4   : > { %s1653_s30 = sadd.s32 1, %s1587_s27   ;;  %s179_s8 = sadd.s32 1, %s1583_s26 }
   0x5   : > { %s176_s9 = ssub.s32 %s1587_s27, %s1653_s30  ;;  %p189_p0 = scmp.ne.s32.totalorder %s1583_s26, %s1579_s25 }
   0x6   : > { %p177_p1 = scmp.eq.s32.totalorder %s176_s9, 0  ;;  %p190_p2 = scmp.eq.s32.totalorder %s1308_s28, 1 }
   0x7   : > { %p195_p3 = scmp.ne.s32.totalorder %s1579_s25, %s1575_s24  ;;  %p196_p4 = scmp.eq.s32.totalorder %s1309_s29, 1 }
   0x8   : > { %s1663_s10 = scalar_select %p177_p1, %s1583_s26, %s179_s8  }
   0x9   : > { %p1665_p5 = por %p190_p2, %p189_p0  ;;  %p1669_p6 = por %p196_p4, %p195_p3 }
   0xa   : > { %p1312_p7 = scmp.ge.s32.totalorder %s1587_s27, 1  ;;  %p241_p8 = scmp.lt.s32.totalorder %s1587_s27, 3 }
   0xc   : > { %p242_p9 = pnand %p1312_p7, %p241_p8 }
   0xd   : > { %v1508_v0 = vld [vmem:[%s2181_s1] sm:$0xff] (!%p242_p9)   ;;  %s1678_s15 = sshll.u32 (!%p242_p9), %s1308_s28, 4  ;;  %v1510_v2 = vld [vmem:[%s2183_s3 + $0x8] sm:$0xff] (!%p242_p9)   ;;  %v1511_v3 = vld [vmem:[%s2183_s3 + $0x10] sm:$0xff] (!%p242_p9)   ;;  %vm318_vm0 = vcmask (!%p242_p9), 130048   ;;  %s270_s17 = sand.u32 (!%p242_p9), 1, %s1579_s25  }
   0xe   : > { %245 = sbr.rel (%p242_p9) target bundleno = 1175 (0x497), region = 48  ;;  %p273_p10 = scmp.lt.s32.totalorder (!%p242_p9), %s1678_s15, 31  ;;  %1387 = vmatprep.subr.bf16.mxu0 (!%p242_p9), %v1508_v0  ;;  %v1509_v1 = vld [vmem:[%s2183_s3] sm:$0xff] (!%p242_p9)   ;;  %v1512_v13 = vld [vmem:[%s2183_s3 + $0x18] sm:$0xff] (!%p242_p9)   ;;  %v1514_v21 = vld [vmem:[%s2183_s3 + $0x28] sm:$0xff] (!%p242_p9)  }
   0xf   : > { %1388 = vmatpush3.bf16.msra.mxu0 (!%p242_p9), %v1508_v0  ;;  %1405 = vmatprep.subr.bf16.mxu1 (!%p242_p9), %v1509_v1  ;;  %v1513_v18 = vld [vmem:[%s2183_s3 + $0x20] sm:$0xff] (!%p242_p9)   ;;  %v1515_v31 = vld [vmem:[%s2183_s3 + $0x30] sm:$0xff] (!%p242_p9)   ;;  %v1516_v32 = vld [vmem:[%s2183_s3 + $0x38] sm:$0xff] (!%p242_p9)   ;;  %s2136_s22 = scalar_lea.hbm (!%p242_p9), %s2187_s7, %s1678_s15  ;;  %s1242_s23 = scalar_lea.sflag (!%p242_p9), [#allocation3], %s270_s17 }
  0x10   : > { %1406 = vmatpush3.bf16.msra.mxu1 (!%p242_p9), %v1509_v1  ;;  %v1517_v33 = vld [vmem:[%s2185_s5] sm:$0xff] (!%p242_p9)   ;;  %v1518_v34 = vld [vmem:[%s2185_s5 + $0x8] sm:$0xff] (!%p242_p9)   ;;  %v1519_v35 = vld [vmem:[%s2185_s5 + $0x10] sm:$0xff] (!%p242_p9)  }
  0x11   : > { %1407 = vmatprep.subr.bf16.mxu1 (!%p242_p9), %v1510_v2  ;;  %1437 = vmatprep.subr.bf16.mxu0 (!%p242_p9), %v1517_v33  ;;  %v1520_v36 = vld [vmem:[%s2185_s5 + $0x18] sm:$0xff] (!%p242_p9)   ;;  %v1521_v37 = vld [vmem:[%s2185_s5 + $0x20] sm:$0xff] (!%p242_p9)   ;;  %v1522_v38 = vld [vmem:[%s2185_s5 + $0x28] sm:$0xff] (!%p242_p9)  }
  0x12   : > { %v1315_v39 = vld [vmem:[%s2182_s2] ss:$0 sm:$0xff] (!%p242_p9) }
  0x14   : > { %1408 = vmatpush3.bf16.msra.mxu1 (!%p242_p9), %v1510_v2 }
  0x15   : > { %s274_s18 = scalar_select %p273_p10, %s1678_s15, 31  ;;  %1409 = vmatprep.subr.bf16.mxu1 %v1511_v3 }
  0x17   : > { %s1314_s21 = sshll.u32 %s274_s18, 3  ;;  %s271_s18 = scalar_lea.vmem [#allocation2], %s270_s17 }
  0x18   : > { %s1691_s28 = scalar_lea.vmem %s2180_s0, %s1314_s21  ;;  %1410 = vmatpush3.bf16.msra.mxu1 %v1511_v3  ;;  %s1254_s19 = sshll.u32 %s271_s18, 4  ;;  %s2138_s19 = int_to_ptr.vmem [resolvable:$true] %s1254_s19 }
  0x19   : > { %v279_v4 = vld [vmem:[%s1691_s28] sm:$0xff]  ;;  %v280_v5 = vld [vmem:[%s1691_s28 + $0x8] sm:$0xff]  ;;  %v281_v6 = vld [vmem:[%s1691_s28 + $0x10] sm:$0xff]  ;;  %1411 = vmatprep.subr.bf16.mxu1 %v1512_v13  ;;  %s1525_s29 = scalar_lea.vmem %s2138_s19, 16 }
  0x1a   : > { %v295_v7 = vpack.c.bf16 %v280_v5, %v279_v4  ;;  %v282_v8 = vld [vmem:[%s1691_s28 + $0x18] sm:$0xff]  ;;  %v283_v9 = vld [vmem:[%s1691_s28 + $0x20] sm:$0xff]  ;;  %v284_v10 = vld [vmem:[%s1691_s28 + $0x28] sm:$0xff]  ;;  %p1526_p11 = scmp.ne.s32.totalorder %s2138_s19, %s1525_s29 }
  0x1b   : > { %v296_v11 = vpack.c.bf16 %v282_v8, %v281_v6  ;;  %v297_v12 = vpack.c.bf16 %v284_v10, %v283_v9  ;;  %v285_v14 = vld [vmem:[%s1691_s28 + $0x30] sm:$0xff]  ;;  %v286_v15 = vld [vmem:[%s1691_s28 + $0x38] sm:$0xff]  ;;  %v287_v16 = vld [vmem:[%s1691_s28 + $0x40] sm:$0xff] }
  0x1c   : > { %1389 = vmatprep.mubr.msk.bf16.mxu0 %vm318_vm0, %v295_v7  ;;  %v288_v17 = vld [vmem:[%s1691_s28 + $0x48] sm:$0xff]  ;;  %v298_v19 = vpack.c.bf16 %v286_v15, %v285_v14  ;;  %1412 = vmatpush3.bf16.msra.mxu1 %v1512_v13  ;;  %v289_v22 = vld [vmem:[%s1691_s28 + $0x50] sm:$0xff]  ;;  %v290_v23 = vld [vmem:[%s1691_s28 + $0x58] sm:$0xff]  ;;  %p1527_p12 = pnand %p1526_p11, %p1665_p5 }
  0x1d   : > { %1390 = vmatmul.mubr.msk.bf16.vlgmr.msra.gmra.mrb[0].mxu0 %vm318_vm0, %v296_v11  ;;  %v299_v20 = vpack.c.bf16 %v288_v17, %v287_v16  ;;  %1413 = vmatprep.subr.bf16.mxu1 %v1513_v18  ;;  %v291_v24 = vld [vmem:[%s1691_s28 + $0x60] sm:$0xff]  ;;  %v292_v25 = vld [vmem:[%s1691_s28 + $0x68] sm:$0xff]  ;;  %v300_v26 = vpack.c.bf16 %v290_v23, %v289_v22  ;;  %v293_v28 = vld [vmem:[%s1691_s28 + $0x70] sm:$0xff] }
  0x1e   : > { %1393 = vmatprep.mubr.msk.bf16.mxu0 %vm318_vm0, %v297_v12  ;;  %v301_v27 = vpack.c.bf16 %v292_v25, %v291_v24  ;;  %v294_v29 = vld [vmem:[%s1691_s28 + $0x78] sm:$0xff]  ;;  %1438 = vmatpush3.bf16.msra.mxu0 %v1517_v33  ;;  %p1528_p13 = pneg %p1527_p12  ;;  %s1589_s28 = smov [#allocation2]  }
  0x1f   : > { %v302_v30 = vpack.c.bf16 %v294_v29, %v293_v28  ;;  %1439 = vmatprep.subr.bf16.mxu0 %v1518_v34  ;;  %v1524_v33 = vld [vmem:[%s2185_s5 + $0x38] sm:$0xff]   ;;  %s1529_s8 = sshll.u32 %s1589_s28, 4  ;;  %s1530_s8 = int_to_ptr.vmem [resolvable:$false] %s1529_s8 }
  0x20   : > { %1414 = vmatpush3.bf16.msra.mxu1 %v1513_v18  ;;  %s1531_s9 = scalar_lea.vmem %s1530_s8, 32  ;;  %p1532_p0 = scmp.lt.s32.totalorder %s2138_s19, %s1530_s8 }
  0x21   : > { %1415 = vmatprep.subr.bf16.mxu1 %v1514_v21  ;;  %p1533_p1 = scmp.lt.s32.totalorder %s1531_s9, %s1525_s29 }
  0x22   : > { %1440 = vmatpush3.bf16.msra.mxu0 %v1518_v34  ;;  %v1325_v34 = vld [vmem:[%s2184_s4] ss:$0 sm:$0xff] }
  0x23   : > { %1441 = vmatprep.subr.bf16.mxu0 %v1519_v35  ;;  %p1534_p2 = por %p1533_p1, %p1532_p0 }
  0x24   : > { %1416 = vmatpush3.bf16.msra.mxu1 %v1514_v21 }
  0x25   : > { %1394 = vmatmul.mubr.msk.bf16.gmra.mrb[4].mxu0 %vm318_vm0, %v298_v19  ;;  %1417 = vmatprep.subr.bf16.mxu1 %v1515_v31  ;;  %p1535_p3 = pnand %p1534_p2, %p1528_p13 }
  0x26   : > { %1397 = vmatprep.mubr.msk.bf16.mxu0 %vm318_vm0, %v299_v20  ;;  %1442 = vmatpush3.bf16.msra.mxu0 %v1519_v35 }
  0x27   : > { %1443 = vmatprep.subr.bf16.mxu0 %v1520_v36 }
  0x28   : > { %1418 = vmatpush3.bf16.msra.mxu1 %v1515_v31 }
  0x29   : > { %1419 = vmatprep.subr.bf16.mxu1 %v1516_v32 }
  0x2a   : > { %1444 = vmatpush3.bf16.msra.mxu0 %v1520_v36 }
  0x2b   : > { %1445 = vmatprep.subr.bf16.mxu0 %v1521_v37 }
  0x2c   : > { %1420 = vmatpush3.bf16.msra.mxu1 %v1516_v32  ;;  %v1523_v32 = vld [vmem:[%s2185_s5 + $0x30] sm:$0xff]  }
  0x2d   : > { %1398 = vmatmul.mubr.msk.bf16.gmra.mrb[8].mxu0 %vm318_vm0, %v300_v26 }
  0x2e   : > { %1401 = vmatprep.mubr.msk.bf16.mxu0 %vm318_vm0, %v301_v27  ;;  %1446 = vmatpush3.bf16.msra.mxu0 %v1521_v37 }
  0x2f   : > { %1447 = vmatprep.subr.bf16.mxu0 %v1522_v38 }
  0x32   : > { %1448 = vmatpush3.bf16.msra.mxu0 %v1522_v38 }
  0x33   : > { %1449 = vmatprep.subr.bf16.mxu0 %v1523_v32 }
  0x35   : > { %1402 = vmatmul.mubr.msk.bf16.gmra.mrb[12].mxu0 %vm318_vm0, %v302_v30 }
  0x36   : > { %1450 = vmatpush3.bf16.msra.mxu0 %v1523_v32 }
  0x37   : > { %1451 = vmatprep.subr.bf16.mxu0 %v1524_v33 }
  0x3a   : > { %1452 = vmatpush3.bf16.msra.mxu0 %v1524_v33 }
  0xf0   : > { %v1391_v40 = vpop.f32.mrb[0].mxu0 }
  0xf1   : > { %v386_v41 = vadd.f32 %v1391_v40, %v1315_v39  ;;  %v377_v42 = vpop.f32.mrb[1].mxu0 }
  0xf2   : > { %v378_v43 = vadd.f32 %v1315_v39, %v377_v42  ;;  %v1392_v44 = vpop.f32.mrb[2].mxu0 }
  0xf3   : > { %v389_v45 = vadd.f32 %v1392_v44, %v1315_v39  ;;  %v380_v46 = vpop.f32.mrb[3].mxu0  ;;  %v442_v48 = vmax.f32 %v386_v41, 0.0 }
  0xf4   : > { %v381_v47 = vadd.f32 %v1315_v39, %v380_v46  ;;  %v440_v50 = vmax.f32 %v378_v43, 0.0 }
  0xf5   : > { %v443_v49 = vmax.f32 %v389_v45, 0.0 }
  0xf6   : > { %v441_v51 = vmax.f32 %v381_v47, 0.0 }
  0xf7   : > { %v457_v52 = vpack.c.bf16 %v443_v49, %v442_v48 }
  0xf8   : > { %v1395_v53 = vpop.f32.mrb[4].mxu0  ;;  %v456_v54 = vpack.c.bf16 %v441_v51, %v440_v50 }
  0xf9   : > { %v402_v55 = vadd.f32 %v1395_v53, %v1315_v39  ;;  %v393_v56 = vpop.f32.mrb[5].mxu0 }
  0xfa   : > { %v394_v57 = vadd.f32 %v1315_v39, %v393_v56  ;;  %v1396_v58 = vpop.f32.mrb[6].mxu0  ;;  %1421 = vmatprep.mubr.bf16.mxu1 %v456_v54 }
  0xfb   : > { %v446_v59 = vmax.f32 %v402_v55, 0.0  ;;  %v405_v60 = vadd.f32 %v1396_v58, %v1315_v39  ;;  %v396_v61 = vpop.f32.mrb[7].mxu0  ;;  %1422 = vmatmul.mubr.bf16.vlgmr.msra.gmra.mrb[0].mxu1 %v457_v52 }
  0xfc   : > { %v397_v62 = vadd.f32 %v1315_v39, %v396_v61  ;;  %v444_v0 = vmax.f32 %v394_v57, 0.0 }
  0xfd   : > { %v447_v63 = vmax.f32 %v405_v60, 0.0 }
  0xfe   : > { %v445_v1 = vmax.f32 %v397_v62, 0.0 }
  0xff   : > { %v459_v2 = vpack.c.bf16 %v447_v63, %v446_v59 }
 0x100   : > { %v458_v3 = vpack.c.bf16 %v445_v1, %v444_v0  ;;  %v1399_v4 = vpop.f32.mrb[8].mxu0 }
 0x101   : > { %v418_v5 = vadd.f32 %v1399_v4, %v1315_v39  ;;  %v409_v6 = vpop.f32.mrb[9].mxu0 }
 0x102   : > { %v410_v7 = vadd.f32 %v1315_v39, %v409_v6  ;;  %v1400_v8 = vpop.f32.mrb[10].mxu0  ;;  %1425 = vmatprep.mubr.bf16.mxu1 %v458_v3 }
 0x103   : > { %v450_v9 = vmax.f32 %v418_v5, 0.0  ;;  %v421_v10 = vadd.f32 %v1400_v8, %v1315_v39  ;;  %v412_v11 = vpop.f32.mrb[11].mxu0  ;;  %1426 = vmatmul.mubr.bf16.gmra.mrb[4].mxu1 %v459_v2 }
 0x104   : > { %v413_v12 = vadd.f32 %v1315_v39, %v412_v11  ;;  %v448_v14 = vmax.f32 %v410_v7, 0.0 }
 0x105   : > { %v451_v13 = vmax.f32 %v421_v10, 0.0 }
 0x106   : > { %v449_v15 = vmax.f32 %v413_v12, 0.0 }
 0x107   : > { %v461_v16 = vpack.c.bf16 %v451_v13, %v450_v9 }
 0x108   : > { %v460_v17 = vpack.c.bf16 %v449_v15, %v448_v14  ;;  %v1403_v18 = vpop.f32.mrb[12].mxu0 }
 0x109   : > { %v434_v19 = vadd.f32 %v1403_v18, %v1315_v39  ;;  %v425_v20 = vpop.f32.mrb[13].mxu0 }
 0x10a   : > { %v426_v21 = vadd.f32 %v1315_v39, %v425_v20  ;;  %v1404_v22 = vpop.f32.mrb[14].mxu0  ;;  %1429 = vmatprep.mubr.bf16.mxu1 %v460_v17 }
 0x10b   : > { %v454_v23 = vmax.f32 %v434_v19, 0.0  ;;  %v437_v24 = vadd.f32 %v1404_v22, %v1315_v39  ;;  %v428_v25 = vpop.f32.mrb[15].mxu0  ;;  %1430 = vmatmul.mubr.bf16.gmra.mrb[8].mxu1 %v461_v16 }
 0x10c   : > { %v429_v26 = vadd.f32 %v1315_v39, %v428_v25  ;;  %v452_v28 = vmax.f32 %v426_v21, 0.0 }
 0x10d   : > { %v455_v27 = vmax.f32 %v437_v24, 0.0 }
 0x10e   : > { %v453_v29 = vmax.f32 %v429_v26, 0.0 }
 0x10f   : > { %v463_v30 = vpack.c.bf16 %v455_v27, %v454_v23  ;;  %v824_v27 = vlaneseq }
 0x110   : > { %v462_v31 = vpack.c.bf16 %v453_v29, %v452_v28  ;;  %v1334_v29 = vld [vmem:[%s2186_s6] ss:$0 sm:$0xff] }
 0x111   : > { %v1766_v28 = vand.u32 127, %v824_v27 }
 0x112   : > { %1433 = vmatprep.mubr.bf16.mxu1 %v462_v31 }
 0x113   : > { %1434 = vmatmul.mubr.bf16.gmra.mrb[12].mxu1 %v463_v30  ;;  %vm826_vm1 = vcmp.lt.s32.totalorder %v1766_v28, 6 }
 0x1ce   : > { %v1423_v35 = vpop.f32.mrb[0].mxu1 }
 0x1cf   : > { %v578_v36 = vadd.f32 %v1423_v35, %v1325_v34  ;;  %v569_v37 = vpop.f32.mrb[1].mxu1 }
 0x1d0   : > { %v570_v38 = vadd.f32 %v1325_v34, %v569_v37  ;;  %v1424_v39 = vpop.f32.mrb[2].mxu1 }
 0x1d1   : > { %v581_v40 = vadd.f32 %v1424_v39, %v1325_v34  ;;  %v572_v41 = vpop.f32.mrb[3].mxu1  ;;  %v634_v43 = vmax.f32 %v578_v36, 0.0 }
 0x1d2   : > { %v573_v42 = vadd.f32 %v1325_v34, %v572_v41  ;;  %v632_v45 = vmax.f32 %v570_v38, 0.0 }
 0x1d3   : > { %v635_v44 = vmax.f32 %v581_v40, 0.0 }
 0x1d4   : > { %v633_v46 = vmax.f32 %v573_v42, 0.0 }
 0x1d5   : > { %v649_v47 = vpack.c.bf16 %v635_v44, %v634_v43 }
 0x1d6   : > { %v648_v48 = vpack.c.bf16 %v633_v46, %v632_v45  ;;  %v1427_v49 = vpop.f32.mrb[4].mxu1 }
 0x1d7   : > { %v594_v50 = vadd.f32 %v1427_v49, %v1325_v34  ;;  %v585_v51 = vpop.f32.mrb[5].mxu1 }
 0x1d8   : > { %v586_v52 = vadd.f32 %v1325_v34, %v585_v51  ;;  %v1428_v53 = vpop.f32.mrb[6].mxu1  ;;  %1453 = vmatprep.mubr.bf16.mxu0 %v648_v48 }
 0x1d9   : > { %v597_v54 = vadd.f32 %v1428_v53, %v1325_v34  ;;  %v588_v55 = vpop.f32.mrb[7].mxu1  ;;  %1454 = vmatmul.mubr.bf16.vlgmr.msra.gmra.mrb[16].mxu0 %v649_v47  ;;  %v638_v57 = vmax.f32 %v594_v50, 0.0 }
 0x1da   : > { %v589_v56 = vadd.f32 %v1325_v34, %v588_v55  ;;  %v636_v59 = vmax.f32 %v586_v52, 0.0 }
 0x1db   : > { %v639_v58 = vmax.f32 %v597_v54, 0.0 }
 0x1dc   : > { %v637_v60 = vmax.f32 %v589_v56, 0.0 }
 0x1dd   : > { %v651_v61 = vpack.c.bf16 %v639_v58, %v638_v57 }
 0x1de   : > { %v650_v62 = vpack.c.bf16 %v637_v60, %v636_v59  ;;  %v1431_v63 = vpop.f32.mrb[8].mxu1 }
 0x1df   : > { %v610_v0 = vadd.f32 %v1431_v63, %v1325_v34  ;;  %v601_v1 = vpop.f32.mrb[9].mxu1 }
 0x1e0   : > { %v602_v2 = vadd.f32 %v1325_v34, %v601_v1  ;;  %v1432_v3 = vpop.f32.mrb[10].mxu1  ;;  %1457 = vmatprep.mubr.bf16.mxu0 %v650_v62 }
 0x1e1   : > { %v613_v4 = vadd.f32 %v1432_v3, %v1325_v34  ;;  %v604_v5 = vpop.f32.mrb[11].mxu1  ;;  %1458 = vmatmul.mubr.bf16.gmra.mrb[20].mxu0 %v651_v61  ;;  %v642_v7 = vmax.f32 %v610_v0, 0.0 }
 0x1e2   : > { %v605_v6 = vadd.f32 %v1325_v34, %v604_v5  ;;  %v640_v9 = vmax.f32 %v602_v2, 0.0 }
 0x1e3   : > { %v643_v8 = vmax.f32 %v613_v4, 0.0 }
 0x1e4   : > { %v641_v10 = vmax.f32 %v605_v6, 0.0 }
 0x1e5   : > { %v653_v11 = vpack.c.bf16 %v643_v8, %v642_v7 }
 0x1e6   : > { %v652_v12 = vpack.c.bf16 %v641_v10, %v640_v9  ;;  %v1435_v13 = vpop.f32.mrb[12].mxu1 }
 0x1e7   : > { %v626_v14 = vadd.f32 %v1435_v13, %v1325_v34  ;;  %v617_v15 = vpop.f32.mrb[13].mxu1 }
 0x1e8   : > { %v618_v16 = vadd.f32 %v1325_v34, %v617_v15  ;;  %v1436_v17 = vpop.f32.mrb[14].mxu1  ;;  %1461 = vmatprep.mubr.bf16.mxu0 %v652_v12 }
 0x1e9   : > { %v629_v18 = vadd.f32 %v1436_v17, %v1325_v34  ;;  %v620_v19 = vpop.f32.mrb[15].mxu1  ;;  %1462 = vmatmul.mubr.bf16.gmra.mrb[24].mxu0 %v653_v11  ;;  %v646_v21 = vmax.f32 %v626_v14, 0.0 }
 0x1ea   : > { %v621_v20 = vadd.f32 %v1325_v34, %v620_v19  ;;  %v644_v23 = vmax.f32 %v618_v16, 0.0 }
 0x1eb   : > { %v647_v22 = vmax.f32 %v629_v18, 0.0 }
 0x1ec   : > { %v645_v24 = vmax.f32 %v621_v20, 0.0 }
 0x1ed   : > { %v655_v25 = vpack.c.bf16 %v647_v22, %v646_v21 }
 0x1ee   : > { %v654_v26 = vpack.c.bf16 %v645_v24, %v644_v23 }
 0x1f0   : > { %1465 = vmatprep.mubr.bf16.mxu0 %v654_v26 }
 0x1f1   : > { %1466 = vmatmul.mubr.bf16.gmra.mrb[28].mxu0 %v655_v25 }
 0x2ac   : > { %v1455_v30 = vpop.f32.mrb[16].mxu0 }
 0x2ad   : > { %v770_v31 = vadd.f32 %v1455_v30, %v1334_v29  ;;  %v761_v32 = vpop.f32.mrb[17].mxu0 }
 0x2ae   : > { %v762_v33 = vadd.f32 %v1334_v29, %v761_v32  ;;  %v1456_v34 = vpop.f32.mrb[18].mxu0 }
 0x2af   : > { %v773_v35 = vadd.f32 %v1456_v34, %v1334_v29  ;;  %v764_v36 = vpop.f32.mrb[19].mxu0  ;;  %v829_v37 = vsel %vm826_vm1, %v770_v31, -inf }
 0x2b0   : > { %v765_v38 = vadd.f32 %v1334_v29, %v764_v36  ;;  %847 = vmax.xlane.f32.xlu1 %v829_v37  ;;  %v827_v39 = vsel %vm826_vm1, %v762_v33, -inf }
 0x2b1   : > { %843 = vmax.xlane.f32.xlu0 %v827_v39  ;;  %v1778_v40 = vsel %vm826_vm1, %v773_v35, -inf }
 0x2b2   : > { %v1783_v42 = vsel %vm826_vm1, %v765_v38, -inf }
 0x2b4   : > { %849 = vmax.xlane.f32.xlu1 %v1778_v40  ;;  %v1459_v41 = vpop.f32.mrb[20].mxu0 }
 0x2b5   : > { %v786_v43 = vadd.f32 %v1459_v41, %v1334_v29  ;;  %v777_v44 = vpop.f32.mrb[21].mxu0  ;;  %845 = vmax.xlane.f32.xlu0 %v1783_v42 }
 0x2b6   : > { %v1460_v45 = vpop.f32.mrb[22].mxu0  ;;  %v778_v49 = vadd.f32 %v1334_v29, %v777_v44 }
 0x2b7   : > { %v789_v46 = vadd.f32 %v1460_v45, %v1334_v29  ;;  %v780_v47 = vpop.f32.mrb[23].mxu0  ;;  %v1788_v48 = vsel %vm826_vm1, %v786_v43, -inf }
 0x2b8   : > { %v781_v50 = vadd.f32 %v1334_v29, %v780_v47  ;;  %v1798_v53 = vsel %vm826_vm1, %v778_v49, -inf }
 0x2b9   : > { %855 = vmax.xlane.f32.xlu0 %v1788_v48  ;;  %v1793_v51 = vsel %vm826_vm1, %v789_v46, -inf }
 0x2ba   : > { %857 = vmax.xlane.f32.xlu1 %v1793_v51  ;;  %v1803_v56 = vsel %vm826_vm1, %v781_v50, -inf }
 0x2bc   : > { %v1463_v52 = vpop.f32.mrb[24].mxu0 }
 0x2bd   : > { %v802_v54 = vadd.f32 %v1463_v52, %v1334_v29  ;;  %v793_v55 = vpop.f32.mrb[25].mxu0  ;;  %851 = vmax.xlane.f32.xlu0 %v1798_v53 }
 0x2be   : > { %v1464_v57 = vpop.f32.mrb[26].mxu0  ;;  %853 = vmax.xlane.f32.xlu1 %v1803_v56  ;;  %v794_v61 = vadd.f32 %v1334_v29, %v793_v55 }
 0x2bf   : > { %v805_v58 = vadd.f32 %v1464_v57, %v1334_v29  ;;  %v796_v59 = vpop.f32.mrb[27].mxu0  ;;  %v1808_v60 = vsel %vm826_vm1, %v802_v54, -inf }
 0x2c0   : > { %v797_v62 = vadd.f32 %v1334_v29, %v796_v59  ;;  %v1818_v1 = vsel %vm826_vm1, %v794_v61, -inf }
 0x2c1   : > { %863 = vmax.xlane.f32.xlu0 %v1808_v60  ;;  %v1813_v63 = vsel %vm826_vm1, %v805_v58, -inf }
 0x2c2   : > { %865 = vmax.xlane.f32.xlu1 %v1813_v63  ;;  %v1823_v3 = vsel %vm826_vm1, %v797_v62, -inf }
 0x2c4   : > { %v1467_v0 = vpop.f32.mrb[28].mxu0 }
 0x2c5   : > { %v809_v2 = vpop.f32.mrb[29].mxu0  ;;  %859 = vmax.xlane.f32.xlu0 %v1818_v1  ;;  %v818_v7 = vadd.f32 %v1467_v0, %v1334_v29 }
 0x2c6   : > { %v810_v4 = vadd.f32 %v1334_v29, %v809_v2  ;;  %v1468_v5 = vpop.f32.mrb[30].mxu0  ;;  %861 = vmax.xlane.f32.xlu1 %v1823_v3 }
 0x2c7   : > { %v812_v6 = vpop.f32.mrb[31].mxu0  ;;  %v821_v10 = vadd.f32 %v1468_v5, %v1334_v29  ;;  %v1838_v12 = vsel %vm826_vm1, %v818_v7, -inf }
 0x2c8   : > { %v813_v8 = vadd.f32 %v1334_v29, %v812_v6  ;;  %v1828_v9 = vsel %vm826_vm1, %v810_v4, -inf }
 0x2c9   : > { %867 = vmax.xlane.f32.xlu0 %v1828_v9  ;;  %v1843_v13 = vsel %vm826_vm1, %v821_v10, -inf }
 0x2ca   : > { %v1833_v11 = vsel %vm826_vm1, %v813_v8, -inf }
 0x2cb   : > { %869 = vmax.xlane.f32.xlu1 %v1833_v11 }
 0x2cd   : > { %871 = vmax.xlane.f32.xlu0 %v1838_v12 }
 0x2cf   : > { %873 = vmax.xlane.f32.xlu1 %v1843_v13 }
 0x33d   : > { %v848_v14 = vpop.xlane.xlu1 %847 }
 0x33e   : > { %vm877_vm2 = vcmp.eq.f32.partialorder %v829_v37, %v848_v14  ;;  %v844_v15 = vpop.xlane.xlu0 %843 }
 0x33f   : > { %v1847_v16 = vsel %vm877_vm2, %v1766_v28, 1073741824  ;;  %vm875_vm3 = vcmp.eq.f32.partialorder %v827_v39, %v844_v15 }
 0x340   : > { %v1850_v17 = vsel %vm875_vm3, %v1766_v28, 1073741824  ;;  %v936_v18 = vshra.s32 %v1847_v16, 16 }
 0x341   : > { %v850_v19 = vpop.xlane.xlu1 %849  ;;  %v908_v22 = vshra.s32 %v1850_v17, 16 }
 0x342   : > { %vm878_vm4 = vcmp.eq.f32.partialorder %v1778_v40, %v850_v19  ;;  %v846_v20 = vpop.xlane.xlu0 %845  ;;  %v1854_v21 = vcvt.s32.f32 %v936_v18  ;;  %v907_v19 = vand.u32 65535, %v1850_v17 }
 0x343   : > { %v1858_v23 = vsel %vm878_vm4, %v1766_v28, 1073741824  ;;  %vm876_vm5 = vcmp.eq.f32.partialorder %v1783_v42, %v846_v20  ;;  %v1868_v30 = vcvt.s32.f32 %v908_v22 }
 0x344   : > { %v1862_v24 = vsel %vm876_vm5, %v1766_v28, 1073741824  ;;  %939 = vmin.xlane.f32.xlu0 %v1854_v21  ;;  %v950_v25 = vshra.s32 %v1858_v23, 16  ;;  %v949_v20 = vand.u32 65535, %v1858_v23 }
 0x345   : > { %v922_v31 = vshra.s32 %v1862_v24, 16 }
 0x346   : > { %v856_v26 = vpop.xlane.xlu0 %855  ;;  %v1866_v29 = vcvt.s32.f32 %v950_v25 }
 0x347   : > { %vm881_vm6 = vcmp.eq.f32.partialorder %v1788_v48, %v856_v26  ;;  %v858_v32 = vpop.xlane.xlu1 %857  ;;  %v1882_v37 = vcvt.s32.f32 %v922_v31  ;;  %v921_v31 = vand.u32 65535, %v1862_v24 }
 0x348   : > { %v1873_v33 = vsel %vm881_vm6, %v1766_v28, 1073741824  ;;  %vm882_vm7 = vcmp.eq.f32.partialorder %v1793_v51, %v858_v32  ;;  %953 = vmin.xlane.f32.xlu1 %v1866_v29  ;;  %911 = vmin.xlane.f32.xlu0 %v1868_v30 }
 0x349   : > { %v1879_v34 = vsel %vm882_vm7, %v1766_v28, 1073741824  ;;  %v992_v35 = vshra.s32 %v1873_v33, 16  ;;  %v991_v17 = vand.u32 65535, %v1873_v33 }
 0x34a   : > { %v852_v36 = vpop.xlane.xlu0 %851  ;;  %v1006_v38 = vshra.s32 %v1879_v34, 16  ;;  %v1005_v24 = vand.u32 65535, %v1879_v34 }
 0x34b   : > { %vm879_vm8 = vcmp.eq.f32.partialorder %v1798_v53, %v852_v36  ;;  %v854_v39 = vpop.xlane.xlu1 %853  ;;  %v1886_v40 = vcvt.s32.f32 %v992_v35  ;;  %v951_v36 = vcvt.s32.f32 %v949_v20 }
 0x34c   : > { %v1889_v41 = vsel %vm879_vm8, %v1766_v28, 1073741824  ;;  %vm880_vm9 = vcmp.eq.f32.partialorder %v1803_v56, %v854_v39  ;;  %925 = vmin.xlane.f32.xlu1 %v1882_v37  ;;  %v1898_v45 = vcvt.s32.f32 %v1006_v38  ;;  %v923_v39 = vcvt.s32.f32 %v921_v31 }
 0x34d   : > { %v1894_v42 = vsel %vm880_vm9, %v1766_v28, 1073741824  ;;  %995 = vmin.xlane.f32.xlu0 %v1886_v40  ;;  %v964_v43 = vshra.s32 %v1889_v41, 16 }
 0x34e   : > { %v864_v44 = vpop.xlane.xlu0 %863  ;;  %v978_v46 = vshra.s32 %v1894_v42, 16 }
 0x34f   : > { %vm885_vm10 = vcmp.eq.f32.partialorder %v1808_v60, %v864_v44  ;;  %v866_v47 = vpop.xlane.xlu1 %865  ;;  %v1902_v48 = vcvt.s32.f32 %v964_v43  ;;  %v963_v43 = vand.u32 65535, %v1889_v41 }
 0x350   : > { %v1905_v49 = vsel %vm885_vm10, %v1766_v28, 1073741824  ;;  %vm886_vm11 = vcmp.eq.f32.partialorder %v1813_v63, %v866_v47  ;;  %1009 = vmin.xlane.f32.xlu1 %v1898_v45  ;;  %v1914_v53 = vcvt.s32.f32 %v978_v46  ;;  %v977_v46 = vand.u32 65535, %v1894_v42 }
 0x351   : > { %v1910_v50 = vsel %vm886_vm11, %v1766_v28, 1073741824  ;;  %967 = vmin.xlane.f32.xlu0 %v1902_v48  ;;  %v1048_v51 = vshra.s32 %v1905_v49, 16  ;;  %v1007_v47 = vcvt.s32.f32 %v1005_v24  ;;  %v1047_v41 = vand.u32 65535, %v1905_v49 }
 0x352   : > { %v860_v52 = vpop.xlane.xlu0 %859  ;;  %v1062_v54 = vshra.s32 %v1910_v50, 16  ;;  %v1061_v42 = vand.u32 65535, %v1910_v50 }
 0x353   : > { %vm883_vm12 = vcmp.eq.f32.partialorder %v1818_v1, %v860_v52  ;;  %v862_v55 = vpop.xlane.xlu1 %861  ;;  %v1918_v56 = vcvt.s32.f32 %v1048_v51 }
 0x354   : > { %v1921_v57 = vsel %vm883_vm12, %v1766_v28, 1073741824  ;;  %vm884_vm13 = vcmp.eq.f32.partialorder %v1823_v3, %v862_v55  ;;  %981 = vmin.xlane.f32.xlu1 %v1914_v53  ;;  %v1930_v61 = vcvt.s32.f32 %v1062_v54  ;;  %v979_v55 = vcvt.s32.f32 %v977_v46 }
 0x355   : > { %v1926_v58 = vsel %vm884_vm13, %v1766_v28, 1073741824  ;;  %1051 = vmin.xlane.f32.xlu0 %v1918_v56  ;;  %v1020_v59 = vshra.s32 %v1921_v57, 16  ;;  %v1019_v49 = vand.u32 65535, %v1921_v57 }
 0x356   : > { %v868_v60 = vpop.xlane.xlu0 %867  ;;  %v1034_v62 = vshra.s32 %v1926_v58, 16  ;;  %v1033_v50 = vand.u32 65535, %v1926_v58 }
 0x357   : > { %vm887_vm14 = vcmp.eq.f32.partialorder %v1828_v9, %v868_v60  ;;  %v1934_v63 = vcvt.s32.f32 %v1020_v59 }
 0x358   : > { %v1937_v0 = vsel %vm887_vm14, %v1766_v28, 1073741824  ;;  %v870_v1 = vpop.xlane.xlu1 %869  ;;  %1065 = vmin.xlane.f32.xlu1 %v1930_v61  ;;  %v1946_v5 = vcvt.s32.f32 %v1034_v62 }
 0x359   : > { %vm888_vm15 = vcmp.eq.f32.partialorder %v1833_v11, %v870_v1  ;;  %1023 = vmin.xlane.f32.xlu0 %v1934_v63  ;;  %v1076_v2 = vshra.s32 %v1937_v0, 16  ;;  %v1063_v1 = vcvt.s32.f32 %v1061_v42  ;;  %v1075_v57 = vand.u32 65535, %v1937_v0 }
 0x35a   : > { %v1944_v3 = vsel %vm888_vm15, %v1766_v28, 1073741824  ;;  %v872_v4 = vpop.xlane.xlu0 %871 }
 0x35b   : > { %vm889_vm0 = vcmp.eq.f32.partialorder %v1838_v12, %v872_v4  ;;  %v1949_v6 = vcvt.s32.f32 %v1076_v2  ;;  %v1090_v7 = vshra.s32 %v1944_v3, 16  ;;  %v1089_v58 = vand.u32 65535, %v1944_v3 }
 0x35c   : > { %v1953_v8 = vsel %vm889_vm0, %v1766_v28, 1073741824  ;;  %v874_v9 = vpop.xlane.xlu1 %873  ;;  %1037 = vmin.xlane.f32.xlu1 %v1946_v5 }
 0x35d   : > { %vm890_vm1 = vcmp.eq.f32.partialorder %v1843_v13, %v874_v9  ;;  %1079 = vmin.xlane.f32.xlu0 %v1949_v6  ;;  %v1958_v10 = vcvt.s32.f32 %v1090_v7  ;;  %v1104_v11 = vshra.s32 %v1953_v8, 16  ;;  %v935_v13 = vand.u32 65535, %v1847_v16 }
 0x35e   : > { %v1962_v12 = vsel %vm890_vm1, %v1766_v28, 1073741824  ;;  %v909_v16 = vcvt.s32.f32 %v907_v19  ;;  %v1035_v9 = vcvt.s32.f32 %v1033_v50  ;;  %v1103_v0 = vand.u32 65535, %v1953_v8 }
 0x35f   : > { %v1964_v14 = vcvt.s32.f32 %v1104_v11  ;;  %v1118_v15 = vshra.s32 %v1962_v12, 16  ;;  %v937_v25 = vcvt.s32.f32 %v935_v13  ;;  %v1117_v3 = vand.u32 65535, %v1962_v12 }
 0x360   : > { %1093 = vmin.xlane.f32.xlu1 %v1958_v10  ;;  %v1091_v19 = vcvt.s32.f32 %v1089_v58  ;;  %v1105_v8 = vcvt.s32.f32 %v1103_v0 }
 0x361   : > { %1107 = vmin.xlane.f32.xlu0 %v1964_v14  ;;  %v1969_v18 = vcvt.s32.f32 %v1118_v15  ;;  %v1119_v12 = vcvt.s32.f32 %v1117_v3 }
 0x364   : > { %1121 = vmin.xlane.f32.xlu1 %v1969_v18 }
 0x3d1   : > { %v1975_v22 = vpop.xlane.xlu0 %939 }
 0x3d2   : > { %vm941_vm2 = vcmp.eq.f32.partialorder %v1854_v21, %v1975_v22  ;;  %v946_v31 = vcvt.f32.s32 %v1975_v22 }
 0x3d3   : > { %v942_v26 = vsel %vm941_vm2, %v937_v25, inf  ;;  %vm1140_vm2 = vcmask 130112  }
 0x3d4   : > { %943 = vmin.xlane.f32.xlu0 %v942_v26 }
 0x3d5   : > { %v1980_v32 = vpop.xlane.xlu1 %953  ;;  %v1982_v35 = vpop.xlane.xlu0 %911 }
 0x3d6   : > { %vm955_vm3 = vcmp.eq.f32.partialorder %v1866_v29, %v1980_v32  ;;  %vm913_vm4 = vcmp.eq.f32.partialorder %v1868_v30, %v1982_v35  ;;  %v993_v29 = vcvt.s32.f32 %v991_v17 }
 0x3d7   : > { %v956_v23 = vsel %vm955_vm3, %v951_v36, inf  ;;  %v914_v21 = vsel %vm913_vm4, %v909_v16, inf  ;;  %v1142_v36 = vadd.s32 4294967280, %v1766_v28  ;;  %v918_v16 = vcvt.f32.s32 %v1982_v35 }
 0x3d8   : > { %957 = vmin.xlane.f32.xlu1 %v956_v23  ;;  %915 = vmin.xlane.f32.xlu0 %v914_v21  ;;  %vm1147_vm3 = vcmask 195712   ;;  %vm1154_vm4 = vcmask 261312  }
 0x3d9   : > { %v1990_v38 = vpop.xlane.xlu1 %925 }
 0x3da   : > { %v1993_v44 = vpop.xlane.xlu0 %995  ;;  %vm927_vm5 = vcmp.eq.f32.partialorder %v1882_v37, %v1990_v38  ;;  %v965_v37 = vcvt.s32.f32 %v963_v43  ;;  %v932_v23 = vcvt.f32.s32 %v1990_v38 }
 0x3db   : > { %v928_v33 = vsel %vm927_vm5, %v923_v39, inf  ;;  %vm997_vm6 = vcmp.eq.f32.partialorder %v1886_v40, %v1993_v44  ;;  %v1002_v21 = vcvt.f32.s32 %v1993_v44  ;;  %v947_v39 = vshll.u32 %v946_v31, 16 }
 0x3dc   : > { %929 = vmin.xlane.f32.xlu1 %v928_v33  ;;  %v998_v30 = vsel %vm997_vm6, %v993_v29, inf  ;;  %v1149_v33 = vadd.s32 4294967272, %v1766_v28  ;;  %v933_v44 = vshll.u32 %v932_v23, 16  ;;  %vm1161_vm5 = vcmask 326912  }
 0x3dd   : > { %v2000_v34 = vpop.xlane.xlu1 %1009  ;;  %999 = vmin.xlane.f32.xlu0 %v998_v30  ;;  %v1003_v46 = vshll.u32 %v1002_v21, 16  ;;  %vm1168_vm6 = vcmask 392512  }
 0x3de   : > { %v2003_v51 = vpop.xlane.xlu0 %967  ;;  %vm1011_vm7 = vcmp.eq.f32.partialorder %v1898_v45, %v2000_v34  ;;  %v1049_v45 = vcvt.s32.f32 %v1047_v41 }
 0x3df   : > { %v1012_v52 = vsel %vm1011_vm7, %v1007_v47, inf  ;;  %vm969_vm8 = vcmp.eq.f32.partialorder %v1902_v48, %v2003_v51  ;;  %v974_v24 = vcvt.f32.s32 %v2003_v51  ;;  %v1135_v47 = vadd.s32 4294967288, %v1766_v28 }
 0x3e0   : > { %1013 = vmin.xlane.f32.xlu1 %v1012_v52  ;;  %v970_v40 = vsel %vm969_vm8, %v965_v37, inf  ;;  %vm1175_vm7 = vcmask 458112   ;;  %vm1182_vm8 = vcmask 523712  }
 0x3e1   : > { %v2010_v54 = vpop.xlane.xlu1 %981  ;;  %971 = vmin.xlane.f32.xlu0 %v970_v40  ;;  %v975_v51 = vshll.u32 %v974_v24, 16 }
 0x3e2   : > { %v2013_v59 = vpop.xlane.xlu0 %1051  ;;  %vm983_vm9 = vcmp.eq.f32.partialorder %v1914_v53, %v2010_v54  ;;  %v1021_v53 = vcvt.s32.f32 %v1019_v49  ;;  %v988_v22 = vcvt.f32.s32 %v2010_v54 }
 0x3e3   : > { %v984_v60 = vsel %vm983_vm9, %v979_v55, inf  ;;  %vm1053_vm10 = vcmp.eq.f32.partialorder %v1918_v56, %v2013_v59  ;;  %vm1189_vm9 = vcmask 589312  }
 0x3e4   : > { %985 = vmin.xlane.f32.xlu1 %v984_v60  ;;  %v1054_v48 = vsel %vm1053_vm10, %v1049_v45, inf  ;;  %v989_v40 = vshll.u32 %v988_v22, 16  ;;  %v1198_v22 = vadd.s32 4294967216, %v1766_v28  ;;  %vm1196_vm10 = vcmask 654912  }
 0x3e5   : > { %v2020_v62 = vpop.xlane.xlu1 %1065  ;;  %1055 = vmin.xlane.f32.xlu0 %v1054_v48  ;;  %v1170_v48 = vadd.s32 4294967248, %v1766_v28 }
 0x3e6   : > { %v2023_v2 = vpop.xlane.xlu0 %1023  ;;  %vm1067_vm11 = vcmp.eq.f32.partialorder %v1930_v61, %v2020_v62  ;;  %v1077_v61 = vcvt.s32.f32 %v1075_v57  ;;  %v1072_v35 = vcvt.f32.s32 %v2020_v62 }
 0x3e7   : > { %v1068_v4 = vsel %vm1067_vm11, %v1063_v1, inf  ;;  %vm1025_vm12 = vcmp.eq.f32.partialorder %v1934_v63, %v2023_v2  ;;  %v1030_v37 = vcvt.f32.s32 %v2023_v2  ;;  %vm1203_vm11 = vcmask 720512  }
 0x3e8   : > { %1069 = vmin.xlane.f32.xlu1 %v1068_v4  ;;  %v1026_v56 = vsel %vm1025_vm12, %v1021_v53, inf  ;;  %v2073_v49 = vshll.u32 %v1072_v35, 16  ;;  %v1184_v35 = vadd.s32 4294967232, %v1766_v28  ;;  %vm1210_vm12 = vcmask 786112  }
 0x3e9   : > { %v2030_v7 = vpop.xlane.xlu1 %1037  ;;  %1027 = vmin.xlane.f32.xlu0 %v1026_v56  ;;  %v2081_v53 = vshll.u32 %v1030_v37, 16  ;;  %v1156_v56 = vadd.s32 4294967264, %v1766_v28 }
 0x3ea   : > { %v2033_v11 = vpop.xlane.xlu0 %1079  ;;  %vm1039_vm13 = vcmp.eq.f32.partialorder %v1946_v5, %v2030_v7  ;;  %v1044_v54 = vcvt.f32.s32 %v2030_v7 }
 0x3eb   : > { %v1040_v15 = vsel %vm1039_vm13, %v1035_v9, inf  ;;  %vm1081_vm14 = vcmp.eq.f32.partialorder %v1949_v6, %v2033_v11  ;;  %vm1217_vm13 = vcmask 851712  }
 0x3ec   : > { %1041 = vmin.xlane.f32.xlu1 %v1040_v15  ;;  %v1082_v63 = vsel %vm1081_vm14, %v1077_v61, inf  ;;  %v2084_v58 = vshll.u32 %v1044_v54, 16  ;;  %vm1224_vm14 = vcmask 917312  }
 0x3ed   : > { %v2040_v13 = vpop.xlane.xlu1 %1093  ;;  %1083 = vmin.xlane.f32.xlu0 %v1082_v63 }
 0x3ee   : > { %v2042_v20 = vpop.xlane.xlu0 %1107  ;;  %vm1095_vm15 = vcmp.eq.f32.partialorder %v1958_v10, %v2040_v13  ;;  %v2054_v10 = vshrl.u32 %v824_v27, 7  ;;  %v1058_v27 = vcvt.f32.s32 %v2013_v59  ;;  %v1086_v59 = vcvt.f32.s32 %v2033_v11 }
 0x3ef   : > { %v1096_v5 = vsel %vm1095_vm15, %v1091_v19, inf  ;;  %vm1109_vm0 = vcmp.eq.f32.partialorder %v1964_v14, %v2042_v20  ;;  %v960_v14 = vcvt.f32.s32 %v1980_v32  ;;  %v919_v32 = vshll.u32 %v918_v16, 16 }
 0x3f0   : > { %1097 = vmin.xlane.f32.xlu1 %v1096_v5  ;;  %v1110_v6 = vsel %vm1109_vm0, %v1105_v8, inf  ;;  %v1145_v43 = vsub.s32 %v1142_v36, %v2054_v10  ;;  %v2070_v42 = vshll.u32 %v1058_v27, 16  ;;  %v1152_v45 = vsub.s32 %v1149_v33, %v2054_v10 }
 0x3f1   : > { %v2048_v25 = vpop.xlane.xlu1 %1121  ;;  %1111 = vmin.xlane.f32.xlu0 %v1110_v6  ;;  %v961_v29 = vshll.u32 %v960_v14, 16  ;;  %v1133_v50 = vsub.s32 %v1766_v28, %v2054_v10  ;;  %v1138_v1 = vsub.s32 %v1135_v47, %v2054_v10  ;;  %v2086_v0 = vshll.u32 %v1086_v59, 16 }
 0x3f2   : > { %vm1123_vm1 = vcmp.eq.f32.partialorder %v1969_v18, %v2048_v25  ;;  %v1016_v18 = vcvt.f32.s32 %v2000_v34  ;;  %v1100_v11 = vcvt.f32.s32 %v2040_v13  ;;  %v1114_v61 = vcvt.f32.s32 %v2042_v20 }
 0x3f3   : > { %v1124_v26 = vsel %vm1123_vm1, %v1119_v12, inf  ;;  %v1173_v15 = vsub.s32 %v1170_v48, %v2054_v10  ;;  %v1163_v5 = vadd.s32 4294967256, %v1766_v28  ;;  %v1177_v13 = vadd.s32 4294967240, %v1766_v28 }
 0x3f4   : > { %1125 = vmin.xlane.f32.xlu1 %v1124_v26  ;;  %v1017_v41 = vshll.u32 %v1016_v18, 16  ;;  %v1159_v26 = vsub.s32 %v1156_v56, %v2054_v10  ;;  %v1128_v16 = vcvt.f32.s32 %v2048_v25  ;;  %v1115_v33 = vshll.u32 %v1114_v61, 16 }
 0x3f5   : > { %v1166_v24 = vsub.s32 %v1163_v5, %v2054_v10  ;;  %v1180_v25 = vsub.s32 %v1177_v13, %v2054_v10  ;;  %v1201_v37 = vsub.s32 %v1198_v22, %v2054_v10  ;;  %v1187_v59 = vsub.s32 %v1184_v35, %v2054_v10 }
 0x3f6   : > { %vm1231_vm15 = vcmask 982912   ;;  %vm1238_vm0 = vcmask 1048512  }
 0x461   : > { %v944_v17 = vpop.xlane.xlu0 %943 }
 0x462   : > { %v945_v52 = vcvt.f32.s32 %v944_v17 }
 0x464   : > { %v948_v4 = vadd.s32 %v947_v39, %v945_v52  ;;  %v1191_v52 = vadd.s32 4294967224, %v1766_v28 }
 0x465   : > { %v958_v38 = vpop.xlane.xlu1 %957  ;;  %v916_v30 = vpop.xlane.xlu0 %915 }
 0x466   : > { %v917_v34 = vcvt.f32.s32 %v916_v30  ;;  %v959_v55 = vcvt.f32.s32 %v958_v38  ;;  %v1146_v6 = vrot.slane %v948_v4, %v1145_v43  ;;  %v1101_v43 = vshll.u32 %v1100_v11, 16 }
 0x467   : > { %v1194_v4 = vsub.s32 %v1191_v52, %v2054_v10 }
 0x468   : > { %v920_v62 = vadd.s32 %v919_v32, %v917_v34  ;;  %v962_v7 = vadd.s32 %v961_v29, %v959_v55 }
 0x469   : > { %v930_v60 = vpop.xlane.xlu1 %929 }
 0x46a   : > { %v931_v57 = vcvt.f32.s32 %v930_v60  ;;  %v1000_v2 = vpop.xlane.xlu0 %999  ;;  %v1134_v3 = vrot.slane %v920_v62, %v1133_v50  ;;  %v1153_v36 = vrot.slane %v962_v7, %v1152_v45  ;;  %v1205_v60 = vadd.s32 4294967208, %v1766_v28 }
 0x46b   : > { %v1001_v12 = vcvt.f32.s32 %v1000_v2 }
 0x46c   : > { %v934_v9 = vadd.s32 %v933_v44, %v931_v57  ;;  %v2102_v44 = vshll.u32 %v1128_v16, 16  ;;  %v1212_v57 = vadd.s32 4294967200, %v1766_v28 }
 0x46d   : > { %v1014_v63 = vpop.xlane.xlu1 %1013  ;;  %v1004_v29 = vadd.s32 %v1003_v46, %v1001_v12 }
 0x46e   : > { %v1139_v19 = vrot.slane %v934_v9, %v1138_v1  ;;  %v972_v8 = vpop.xlane.xlu0 %971  ;;  %v1015_v20 = vcvt.f32.s32 %v1014_v63  ;;  %v1219_v9 = vadd.s32 4294967192, %v1766_v28  ;;  %v1226_v63 = vadd.s32 4294967184, %v1766_v28 }
 0x46f   : > { %v973_v31 = vcvt.f32.s32 %v972_v8  ;;  %v1174_v54 = vrot.slane %v1004_v29, %v1173_v15  ;;  %v1215_v5 = vsub.s32 %v1212_v57, %v2054_v10 }
 0x470   : > { %v1141_v14 = vsel %vm1140_vm2, %v1139_v19, %v1134_v3  ;;  %v1018_v38 = vadd.s32 %v1017_v41, %v1015_v20 }
 0x471   : > { %v1148_v17 = vsel %vm1147_vm3, %v1146_v6, %v1141_v14  ;;  %v976_v23 = vadd.s32 %v975_v51, %v973_v31  ;;  %v986_v21 = vpop.xlane.xlu1 %985  ;;  %v1233_v14 = vadd.s32 4294967176, %v1766_v28 }
 0x472   : > { %v1155_v18 = vsel %vm1154_vm4, %v1153_v36, %v1148_v17  ;;  %v987_v39 = vcvt.f32.s32 %v986_v21  ;;  %v1056_v27 = vpop.xlane.xlu0 %1055 }
 0x473   : > { %v1160_v32 = vrot.slane %v976_v23, %v1159_v26  ;;  %v1057_v55 = vcvt.f32.s32 %v1056_v27  ;;  %v1222_v26 = vsub.s32 %v1219_v9, %v2054_v10 }
 0x474   : > { %v990_v30 = vadd.s32 %v989_v40, %v987_v39  ;;  %v1181_v40 = vrot.slane %v1018_v38, %v1180_v25  ;;  %v1236_v39 = vsub.s32 %v1233_v14, %v2054_v10 }
 0x475   : > { %v1162_v34 = vsel %vm1161_vm5, %v1160_v32, %v1155_v18  ;;  %v1070_v47 = vpop.xlane.xlu1 %1069  ;;  %v1060_v11 = vadd.s32 %v2070_v42, %v1057_v55 }
 0x476   : > { %v1167_v51 = vrot.slane %v990_v30, %v1166_v24  ;;  %v1028_v46 = vpop.xlane.xlu0 %1027  ;;  %v1071_v48 = vcvt.f32.s32 %v1070_v47 }
 0x477   : > { %v1029_v41 = vcvt.f32.s32 %v1028_v46 }
 0x478   : > { %v1169_v45 = vsel %vm1168_vm6, %v1167_v51, %v1162_v34  ;;  %v1074_v3 = vadd.s32 %v2073_v49, %v1071_v48  ;;  %v1202_v49 = vrot.slane %v1060_v11, %v1201_v37 }
 0x479   : > { %v1176_v50 = vsel %vm1175_vm7, %v1174_v54, %v1169_v45  ;;  %v1032_v62 = vadd.s32 %v2081_v53, %v1029_v41  ;;  %v1042_v1 = vpop.xlane.xlu1 %1041  ;;  %v1208_v53 = vsub.s32 %v1205_v60, %v2054_v10 }
 0x47a   : > { %v1183_v2 = vsel %vm1182_vm8, %v1181_v40, %v1176_v50  ;;  %v1043_v56 = vcvt.f32.s32 %v1042_v1  ;;  %v1084_v7 = vpop.xlane.xlu0 %1083 }
 0x47b   : > { %v1188_v61 = vrot.slane %v1032_v62, %v1187_v59  ;;  %v1085_v15 = vcvt.f32.s32 %v1084_v7  ;;  %v1209_v20 = vrot.slane %v1074_v3, %v1208_v53 }
 0x47c   : > { %v1046_v19 = vadd.s32 %v2084_v58, %v1043_v56  ;;  %v1229_v58 = vsub.s32 %v1226_v63, %v2054_v10 }
 0x47d   : > { %v1190_v8 = vsel %vm1189_vm9, %v1188_v61, %v1183_v2  ;;  %v1088_v6 = vadd.s32 %v2086_v0, %v1085_v15  ;;  %v1098_v42 = vpop.xlane.xlu1 %1097 }
 0x47e   : > { %v1195_v12 = vrot.slane %v1046_v19, %v1194_v4  ;;  %v1099_v31 = vcvt.f32.s32 %v1098_v42  ;;  %v1112_v36 = vpop.xlane.xlu0 %1111 }
 0x47f   : > { %v1113_v13 = vcvt.f32.s32 %v1112_v36  ;;  %v1216_v23 = vrot.slane %v1088_v6, %v1215_v5 }
 0x480   : > { %v1197_v16 = vsel %vm1196_vm10, %v1195_v12, %v1190_v8  ;;  %v1102_v0 = vadd.s32 %v1101_v43, %v1099_v31 }
 0x481   : > { %v1204_v17 = vsel %vm1203_vm11, %v1202_v49, %v1197_v16  ;;  %v1116_v21 = vadd.s32 %v1115_v33, %v1113_v13  ;;  %v1126_v18 = vpop.xlane.xlu1 %1125 }
 0x482   : > { %v1211_v28 = vsel %vm1210_vm12, %v1209_v20, %v1204_v17  ;;  %v1223_v24 = vrot.slane %v1102_v0, %v1222_v26  ;;  %v1127_v22 = vcvt.f32.s32 %v1126_v18 }
 0x483   : > { %v1218_v27 = vsel %vm1217_vm13, %v1216_v23, %v1211_v28  ;;  %v1230_v29 = vrot.slane %v1116_v21, %v1229_v58 }
 0x484   : > { %v1130_v32 = vadd.s32 %v2102_v44, %v1127_v22  ;;  %v1225_v35 = vsel %vm1224_vm14, %v1223_v24, %v1218_v27 }
 0x485   : > { %v1232_v33 = vsel %vm1231_vm15, %v1230_v29, %v1225_v35 }
 0x486   : > { %v1237_v43 = vrot.slane %v1130_v32, %v1236_v39 }
 0x488   : > { %v1239_v10 = vsel %vm1238_vm0, %v1237_v43, %v1232_v33 }
 0x489   : > { %1240 = vst [vmem:[%s271_s18] sm:$0x1] %v1239_v10 }
 0x48a   : > { %1538 = shalt.err (!%p1535_p3)
}
 0x48b   : > { %s1539_s15 = scalar_lea.hbm %s2136_s22, 16  ;;  %s1543_s16 = scalar_lea.hbm %s2187_s7, 32 }
 0x48c   : > { %p1540_p4 = scmp.ne.s32.totalorder %s2136_s22, %s1539_s15  ;;  %p1544_p9 = scmp.lt.u32.totalorder %s2136_s22, %s2187_s7 }
 0x48d   : > { %p1545_p10 = scmp.lt.u32.totalorder %s1543_s16, %s1539_s15  ;;  %p1547_p12 = scmp.lt.u32.totalorder %s1539_s15, %s2136_s22 }
 0x48e   : > { %p1541_p7 = pnand %p1540_p4, %p1665_p5 }
 0x48f   : > { %p1546_p11 = por %p1545_p10, %p1544_p9 }
 0x490   : > { %p1542_p8 = pneg %p1541_p7 }
 0x491   : > { %p1548_p13 = por %p1547_p12, %p1546_p11 }
 0x493   : > { %p1549_p0 = pnand %p1548_p13, %p1542_p8 }
 0x495   : > { %1552 = shalt.err (!%p1549_p0)
}
 0x496   : > { %1469 = dma.vmem_to_hbm [thread:$0]  (%p1665_p5), %s2138_s19, 16, %s2136_s22, %s1242_s23  }
 0x497 PF: > { %p1475_p1 = scmp.ge.s32.totalorder %s1587_s27, 2  ;;  %s1266_s20 = sand.u32 1, %s1575_s24  }
 0x498   : > { %s1267_s21 = scalar_lea.sflag [#allocation3], %s1266_s20 }
 0x499   : > { %p1472_p2 = pnand %p1475_p1, %p1669_p6 }
 0x49b   : > { %1570 = dma.done.wait (!%p1472_p2), %s1267_s21, 16  }
 0x49c   : > { %1572 = vsyncadd (!%p1472_p2), %s1267_s21, 4294967280  ;;  %p17_p3 = scmp.ge.s32.totalorder %s1653_s30, 4   ;;  %s2190_s24 = smov %s1579_s25 }
 0x49d   : > { %s2191_s25 = smov %s1583_s26  ;;  %s2192_s26 = smov %s1663_s10 }
 0x49e   : > { %s2193_s27 = smov %s1653_s30  ;;  %19 = sbr.rel (!%p17_p3) target bundleno = 3 (0x3), region = 83 }
 0x4a5   :  { %1271 = vsyncpa [#allocation3], 1 }
 0x4a6   :  { %1273 = vsyncpa [#allocation3 + $0x1], 1 }

</bundles_post_ra>
